<compile_context>
chip_gen: v6e
topology: v6e:2x2x1
jax: 0.10.0
libtpu: 0.0.40
codegen_flags: <defaults>
</compile_context>

<pallas_src>
import functools

import jax
import jax.numpy as jnp
from jax import lax
from jax.experimental import pallas as pl
from jax.experimental.pallas import tpu as pltpu


CHUNK_SUBLANES = 32                      # inner chunk = (32, 128) f32 slabs (4 vregs each)
GRANULE = CHUNK_SUBLANES * 128           # batch-tile granularity (4096 elements)


def _round_up(n, m):
    return ((n + m - 1) // m) * m


def _mlp_kernel(w1_ref, b1_ref, w2_ref, b2_ref, w3_ref, b3_ref, x_ref, o_ref):
    """Fused AdvancedNet forward on one batch tile.

    x_ref: (IN, S, 128) f32 VMEM  -- batch packed across sublanes (S) and lanes (128)
    o_ref: (S, 128)     f32 VMEM  -- dense, unmasked output slab
    w*/b*: tiny PyTorch-layout (out, in) / (out,) tables, resident in SMEM.
    """
    h1_dim, in_dim = w1_ref.shape        # (8, 2)
    h2_dim, _ = w2_ref.shape             # (4, 8)
    s_total = x_ref.shape[1]             # tb // 128 (static)
    n_chunks = s_total // CHUNK_SUBLANES

    # Hoist every SMEM scalar read out of the chunk loop (once per grid step).
    w1 = [[w1_ref[j, k] for k in range(in_dim)] for j in range(h1_dim)]
    b1 = [b1_ref[j] for j in range(h1_dim)]
    w2 = [[w2_ref[j, k] for k in range(h1_dim)] for j in range(h2_dim)]
    b2 = [b2_ref[j] for j in range(h2_dim)]
    w3 = [w3_ref[0, k] for k in range(h2_dim)]
    b3 = b3_ref[0]

    def chunk_body(c, carry):
        r = pl.multiple_of(c * CHUNK_SUBLANES, CHUNK_SUBLANES)

        # in_dim (=2) input slabs of shape (CHUNK, 128).
        x_rows = [x_ref[k, pl.ds(r, CHUNK_SUBLANES), :] for k in range(in_dim)]

        # Streaming accumulation: fold each ReLU'd h1 row straight into the
        # h2 accumulators so at most ~8 slabs stay live (no vreg spills).
        h2_acc = [None] * h2_dim
        for j in range(h1_dim):
            acc = x_rows[0] * w1[j][0]
            for k in range(1, in_dim):
                acc = acc + x_rows[k] * w1[j][k]
            h1_j = jnp.maximum(acc + b1[j], 0.0)
            for m in range(h2_dim):
                t = h1_j * w2[m][j]
                h2_acc[m] = t if h2_acc[m] is None else h2_acc[m] + t

        # Finish layer 2 (bias + ReLU) and stream into the scalar output row.
        out = None
        for m in range(h2_dim):
            h2_m = jnp.maximum(h2_acc[m] + b2[m], 0.0)
            t = h2_m * w3[m]
            out = t if out is None else out + t

        o_ref[pl.ds(r, CHUNK_SUBLANES), :] = out + b3
        return carry

    lax.fori_loop(0, n_chunks, chunk_body, 0, unroll=False)


@functools.partial(jax.jit, static_argnames=("tile_batch",))
def advanced_net_forward(x, params, tile_batch=256 * 1024):
    """Forward pass of AdvancedNet via one Pallas call over a batch grid.

    x: (batch, input_dim) f32, PyTorch-style layout.
    params: (w1, b1, w2, b2, w3, b3) with PyTorch nn.Linear shapes
            w: (out, in), b: (out,).
    Returns (batch, 1) f32.
    """
    w1, b1, w2, b2, w3, b3 = params
    batch, in_dim = x.shape

    # Batch tile: large (amortize per-step overhead), multiple of GRANULE
    # (full (8,128) vreg packing + inner chunk loop), capped so big batches
    # still give ~8 grid steps (v7x megacore) and VMEM stays <= ~6 MiB (v5e-safe).
    cap = _round_up(tile_batch, GRANULE)
    want = _round_up(max(batch // 8, 1), GRANULE)
    tb = max(GRANULE, min(cap, want))

    padded = _round_up(batch, tb)
    grid = (padded // tb,)
    s_tile = tb // 128

    # Feature-major input packed across sublanes AND lanes:
    #   (batch, in) -> (in, padded) -> (in, padded//128, 128)
    # Single jnp.pad (no zeros+scatter); pad lanes are sliced off below.
    # TODO(synk): accept feature-major (in_dim, batch) input from the producer to
    # drop this transpose copy entirely.
    x_t = jnp.pad(x.astype(jnp.float32).T, ((0, 0), (0, padded - batch)))
    x_t = x_t.reshape(in_dim, padded // 128, 128)

    smem_spec = pl.BlockSpec(memory_space=pltpu.MemorySpace.SMEM)

    cost = pl.CostEstimate(
        flops=2 * padded * (in_dim * 8 + 8 * 4 + 4 * 1),
        transcendentals=0,
        bytes_accessed=4 * padded * (in_dim + 1) + 4 * sum(int(p.size) for p in params),
    )

    out = pl.pallas_call(
        _mlp_kernel,
        out_shape=jax.ShapeDtypeStruct((padded // 128, 128), jnp.float32),
        grid=grid,
        in_specs=[smem_spec] * 6 + [
            pl.BlockSpec((in_dim, s_tile, 128), lambda i: (0, i, 0)),  # packed x tile
        ],
        out_specs=pl.BlockSpec((s_tile, 128), lambda i: (i, 0)),        # dense out tile
        compiler_params=pltpu.CompilerParams(
            dimension_semantics=("parallel",),
        ),
        cost_estimate=cost,
    )(w1, b1, w2, b2, w3, b3, x_t)

    return out.reshape(padded)[:batch][:, None]   # back to (batch, 1)


def init_params(key, input_dim=2):
    """Deterministic params with exact PyTorch nn.Linear shapes: W (out, in), b (out,)."""
    ks = jax.random.split(key, 6)
    w1 = jax.random.normal(ks[0], (8, input_dim), jnp.float32) * 0.5
    b1 = jax.random.normal(ks[1], (8,), jnp.float32) * 0.1
    w2 = jax.random.normal(ks[2], (4, 8), jnp.float32) * 0.5
    b2 = jax.random.normal(ks[3], (4,), jnp.float32) * 0.1
    w3 = jax.random.normal(ks[4], (1, 4), jnp.float32) * 0.5
    b3 = jax.random.normal(ks[5], (1,), jnp.float32) * 0.1
    return (w1, b1, w2, b2, w3, b3)


def reference_forward(x, params):
    """Pure-XLA reference (also the preferred path for tiny batches)."""
    w1, b1, w2, b2, w3, b3 = params
    h = jnp.maximum(x @ w1.T + b1, 0.0)
    h = jnp.maximum(h @ w2.T + b2, 0.0)
    return h @ w3.T + b3


if __name__ == "__main__":
    key = jax.random.PRNGKey(0)
    k_x, k_p = jax.random.split(key)

    batch, input_dim = 8, 2
    x = jax.random.normal(k_x, (batch, input_dim), jnp.float32)
    params = init_params(k_p, input_dim=input_dim)

    out = advanced_net_forward(x, params)
    out = jax.block_until_ready(out)

    ref = reference_forward(x, params)
    assert out.shape == (batch, 1), out.shape
    assert jnp.allclose(out, ref, atol=1e-5, rtol=1e-5), (out, ref)

    print("KERNEL_OK")
</pallas_src>

<mosaic_0001>
module attributes {stable_mosaic.version = 11 : i64} {
  func.func @_mlp_kernel(%arg0: i32, %arg1: memref<8x2xf32, #tpu.memory_space<smem>>, %arg2: memref<8xf32, #tpu.memory_space<smem>>, %arg3: memref<4x8xf32, #tpu.memory_space<smem>>, %arg4: memref<4xf32, #tpu.memory_space<smem>>, %arg5: memref<1x4xf32, #tpu.memory_space<smem>>, %arg6: memref<1xf32, #tpu.memory_space<smem>>, %arg7: memref<2x32x128xf32, #tpu.memory_space<vmem>>, %arg8: memref<32x128xf32, #tpu.memory_space<vmem>>) attributes {dimension_semantics = [#tpu.dimension_semantics<parallel>], iteration_bounds = array<i64: 1>, scalar_prefetch = 0 : i64, scratch_operands = 0 : i64, tpu.core_type = #tpu.core_type<tc>, window_params = [{transform_indices = @transform_0, window_bounds = array<i64: 8, 2>}, {transform_indices = @transform_1, window_bounds = array<i64: 8>}, {transform_indices = @transform_2, window_bounds = array<i64: 4, 8>}, {transform_indices = @transform_3, window_bounds = array<i64: 4>}, {transform_indices = @transform_4, window_bounds = array<i64: 1, 4>}, {transform_indices = @transform_5, window_bounds = array<i64: 1>}, {transform_indices = @transform_6, window_bounds = array<i64: 2, 32, 128>}, {transform_indices = @transform_7, window_bounds = array<i64: 32, 128>}]} {
    %c0 = arith.constant 0 : index
    %c0_0 = arith.constant 0 : index
    %0 = memref.load %arg1[%c0, %c0_0] : memref<8x2xf32, #tpu.memory_space<smem>>
    %c0_1 = arith.constant 0 : index
    %c1 = arith.constant 1 : index
    %1 = memref.load %arg1[%c0_1, %c1] : memref<8x2xf32, #tpu.memory_space<smem>>
    %c1_2 = arith.constant 1 : index
    %c0_3 = arith.constant 0 : index
    %2 = memref.load %arg1[%c1_2, %c0_3] : memref<8x2xf32, #tpu.memory_space<smem>>
    %c1_4 = arith.constant 1 : index
    %c1_5 = arith.constant 1 : index
    %3 = memref.load %arg1[%c1_4, %c1_5] : memref<8x2xf32, #tpu.memory_space<smem>>
    %c2 = arith.constant 2 : index
    %c0_6 = arith.constant 0 : index
    %4 = memref.load %arg1[%c2, %c0_6] : memref<8x2xf32, #tpu.memory_space<smem>>
    %c2_7 = arith.constant 2 : index
    %c1_8 = arith.constant 1 : index
    %5 = memref.load %arg1[%c2_7, %c1_8] : memref<8x2xf32, #tpu.memory_space<smem>>
    %c3 = arith.constant 3 : index
    %c0_9 = arith.constant 0 : index
    %6 = memref.load %arg1[%c3, %c0_9] : memref<8x2xf32, #tpu.memory_space<smem>>
    %c3_10 = arith.constant 3 : index
    %c1_11 = arith.constant 1 : index
    %7 = memref.load %arg1[%c3_10, %c1_11] : memref<8x2xf32, #tpu.memory_space<smem>>
    %c4 = arith.constant 4 : index
    %c0_12 = arith.constant 0 : index
    %8 = memref.load %arg1[%c4, %c0_12] : memref<8x2xf32, #tpu.memory_space<smem>>
    %c4_13 = arith.constant 4 : index
    %c1_14 = arith.constant 1 : index
    %9 = memref.load %arg1[%c4_13, %c1_14] : memref<8x2xf32, #tpu.memory_space<smem>>
    %c5 = arith.constant 5 : index
    %c0_15 = arith.constant 0 : index
    %10 = memref.load %arg1[%c5, %c0_15] : memref<8x2xf32, #tpu.memory_space<smem>>
    %c5_16 = arith.constant 5 : index
    %c1_17 = arith.constant 1 : index
    %11 = memref.load %arg1[%c5_16, %c1_17] : memref<8x2xf32, #tpu.memory_space<smem>>
    %c6 = arith.constant 6 : index
    %c0_18 = arith.constant 0 : index
    %12 = memref.load %arg1[%c6, %c0_18] : memref<8x2xf32, #tpu.memory_space<smem>>
    %c6_19 = arith.constant 6 : index
    %c1_20 = arith.constant 1 : index
    %13 = memref.load %arg1[%c6_19, %c1_20] : memref<8x2xf32, #tpu.memory_space<smem>>
    %c7 = arith.constant 7 : index
    %c0_21 = arith.constant 0 : index
    %14 = memref.load %arg1[%c7, %c0_21] : memref<8x2xf32, #tpu.memory_space<smem>>
    %c7_22 = arith.constant 7 : index
    %c1_23 = arith.constant 1 : index
    %15 = memref.load %arg1[%c7_22, %c1_23] : memref<8x2xf32, #tpu.memory_space<smem>>
    %c0_24 = arith.constant 0 : index
    %16 = memref.load %arg2[%c0_24] : memref<8xf32, #tpu.memory_space<smem>>
    %c1_25 = arith.constant 1 : index
    %17 = memref.load %arg2[%c1_25] : memref<8xf32, #tpu.memory_space<smem>>
    %c2_26 = arith.constant 2 : index
    %18 = memref.load %arg2[%c2_26] : memref<8xf32, #tpu.memory_space<smem>>
    %c3_27 = arith.constant 3 : index
    %19 = memref.load %arg2[%c3_27] : memref<8xf32, #tpu.memory_space<smem>>
    %c4_28 = arith.constant 4 : index
    %20 = memref.load %arg2[%c4_28] : memref<8xf32, #tpu.memory_space<smem>>
    %c5_29 = arith.constant 5 : index
    %21 = memref.load %arg2[%c5_29] : memref<8xf32, #tpu.memory_space<smem>>
    %c6_30 = arith.constant 6 : index
    %22 = memref.load %arg2[%c6_30] : memref<8xf32, #tpu.memory_space<smem>>
    %c7_31 = arith.constant 7 : index
    %23 = memref.load %arg2[%c7_31] : memref<8xf32, #tpu.memory_space<smem>>
    %c0_32 = arith.constant 0 : index
    %c0_33 = arith.constant 0 : index
    %24 = memref.load %arg3[%c0_32, %c0_33] : memref<4x8xf32, #tpu.memory_space<smem>>
    %c0_34 = arith.constant 0 : index
    %c1_35 = arith.constant 1 : index
    %25 = memref.load %arg3[%c0_34, %c1_35] : memref<4x8xf32, #tpu.memory_space<smem>>
    %c0_36 = arith.constant 0 : index
    %c2_37 = arith.constant 2 : index
    %26 = memref.load %arg3[%c0_36, %c2_37] : memref<4x8xf32, #tpu.memory_space<smem>>
    %c0_38 = arith.constant 0 : index
    %c3_39 = arith.constant 3 : index
    %27 = memref.load %arg3[%c0_38, %c3_39] : memref<4x8xf32, #tpu.memory_space<smem>>
    %c0_40 = arith.constant 0 : index
    %c4_41 = arith.constant 4 : index
    %28 = memref.load %arg3[%c0_40, %c4_41] : memref<4x8xf32, #tpu.memory_space<smem>>
    %c0_42 = arith.constant 0 : index
    %c5_43 = arith.constant 5 : index
    %29 = memref.load %arg3[%c0_42, %c5_43] : memref<4x8xf32, #tpu.memory_space<smem>>
    %c0_44 = arith.constant 0 : index
    %c6_45 = arith.constant 6 : index
    %30 = memref.load %arg3[%c0_44, %c6_45] : memref<4x8xf32, #tpu.memory_space<smem>>
    %c0_46 = arith.constant 0 : index
    %c7_47 = arith.constant 7 : index
    %31 = memref.load %arg3[%c0_46, %c7_47] : memref<4x8xf32, #tpu.memory_space<smem>>
    %c1_48 = arith.constant 1 : index
    %c0_49 = arith.constant 0 : index
    %32 = memref.load %arg3[%c1_48, %c0_49] : memref<4x8xf32, #tpu.memory_space<smem>>
    %c1_50 = arith.constant 1 : index
    %c1_51 = arith.constant 1 : index
    %33 = memref.load %arg3[%c1_50, %c1_51] : memref<4x8xf32, #tpu.memory_space<smem>>
    %c1_52 = arith.constant 1 : index
    %c2_53 = arith.constant 2 : index
    %34 = memref.load %arg3[%c1_52, %c2_53] : memref<4x8xf32, #tpu.memory_space<smem>>
    %c1_54 = arith.constant 1 : index
    %c3_55 = arith.constant 3 : index
    %35 = memref.load %arg3[%c1_54, %c3_55] : memref<4x8xf32, #tpu.memory_space<smem>>
    %c1_56 = arith.constant 1 : index
    %c4_57 = arith.constant 4 : index
    %36 = memref.load %arg3[%c1_56, %c4_57] : memref<4x8xf32, #tpu.memory_space<smem>>
    %c1_58 = arith.constant 1 : index
    %c5_59 = arith.constant 5 : index
    %37 = memref.load %arg3[%c1_58, %c5_59] : memref<4x8xf32, #tpu.memory_space<smem>>
    %c1_60 = arith.constant 1 : index
    %c6_61 = arith.constant 6 : index
    %38 = memref.load %arg3[%c1_60, %c6_61] : memref<4x8xf32, #tpu.memory_space<smem>>
    %c1_62 = arith.constant 1 : index
    %c7_63 = arith.constant 7 : index
    %39 = memref.load %arg3[%c1_62, %c7_63] : memref<4x8xf32, #tpu.memory_space<smem>>
    %c2_64 = arith.constant 2 : index
    %c0_65 = arith.constant 0 : index
    %40 = memref.load %arg3[%c2_64, %c0_65] : memref<4x8xf32, #tpu.memory_space<smem>>
    %c2_66 = arith.constant 2 : index
    %c1_67 = arith.constant 1 : index
    %41 = memref.load %arg3[%c2_66, %c1_67] : memref<4x8xf32, #tpu.memory_space<smem>>
    %c2_68 = arith.constant 2 : index
    %c2_69 = arith.constant 2 : index
    %42 = memref.load %arg3[%c2_68, %c2_69] : memref<4x8xf32, #tpu.memory_space<smem>>
    %c2_70 = arith.constant 2 : index
    %c3_71 = arith.constant 3 : index
    %43 = memref.load %arg3[%c2_70, %c3_71] : memref<4x8xf32, #tpu.memory_space<smem>>
    %c2_72 = arith.constant 2 : index
    %c4_73 = arith.constant 4 : index
    %44 = memref.load %arg3[%c2_72, %c4_73] : memref<4x8xf32, #tpu.memory_space<smem>>
    %c2_74 = arith.constant 2 : index
    %c5_75 = arith.constant 5 : index
    %45 = memref.load %arg3[%c2_74, %c5_75] : memref<4x8xf32, #tpu.memory_space<smem>>
    %c2_76 = arith.constant 2 : index
    %c6_77 = arith.constant 6 : index
    %46 = memref.load %arg3[%c2_76, %c6_77] : memref<4x8xf32, #tpu.memory_space<smem>>
    %c2_78 = arith.constant 2 : index
    %c7_79 = arith.constant 7 : index
    %47 = memref.load %arg3[%c2_78, %c7_79] : memref<4x8xf32, #tpu.memory_space<smem>>
    %c3_80 = arith.constant 3 : index
    %c0_81 = arith.constant 0 : index
    %48 = memref.load %arg3[%c3_80, %c0_81] : memref<4x8xf32, #tpu.memory_space<smem>>
    %c3_82 = arith.constant 3 : index
    %c1_83 = arith.constant 1 : index
    %49 = memref.load %arg3[%c3_82, %c1_83] : memref<4x8xf32, #tpu.memory_space<smem>>
    %c3_84 = arith.constant 3 : index
    %c2_85 = arith.constant 2 : index
    %50 = memref.load %arg3[%c3_84, %c2_85] : memref<4x8xf32, #tpu.memory_space<smem>>
    %c3_86 = arith.constant 3 : index
    %c3_87 = arith.constant 3 : index
    %51 = memref.load %arg3[%c3_86, %c3_87] : memref<4x8xf32, #tpu.memory_space<smem>>
    %c3_88 = arith.constant 3 : index
    %c4_89 = arith.constant 4 : index
    %52 = memref.load %arg3[%c3_88, %c4_89] : memref<4x8xf32, #tpu.memory_space<smem>>
    %c3_90 = arith.constant 3 : index
    %c5_91 = arith.constant 5 : index
    %53 = memref.load %arg3[%c3_90, %c5_91] : memref<4x8xf32, #tpu.memory_space<smem>>
    %c3_92 = arith.constant 3 : index
    %c6_93 = arith.constant 6 : index
    %54 = memref.load %arg3[%c3_92, %c6_93] : memref<4x8xf32, #tpu.memory_space<smem>>
    %c3_94 = arith.constant 3 : index
    %c7_95 = arith.constant 7 : index
    %55 = memref.load %arg3[%c3_94, %c7_95] : memref<4x8xf32, #tpu.memory_space<smem>>
    %c0_96 = arith.constant 0 : index
    %56 = memref.load %arg4[%c0_96] : memref<4xf32, #tpu.memory_space<smem>>
    %c1_97 = arith.constant 1 : index
    %57 = memref.load %arg4[%c1_97] : memref<4xf32, #tpu.memory_space<smem>>
    %c2_98 = arith.constant 2 : index
    %58 = memref.load %arg4[%c2_98] : memref<4xf32, #tpu.memory_space<smem>>
    %c3_99 = arith.constant 3 : index
    %59 = memref.load %arg4[%c3_99] : memref<4xf32, #tpu.memory_space<smem>>
    %c0_100 = arith.constant 0 : index
    %c0_101 = arith.constant 0 : index
    %60 = memref.load %arg5[%c0_100, %c0_101] : memref<1x4xf32, #tpu.memory_space<smem>>
    %c0_102 = arith.constant 0 : index
    %c1_103 = arith.constant 1 : index
    %61 = memref.load %arg5[%c0_102, %c1_103] : memref<1x4xf32, #tpu.memory_space<smem>>
    %c0_104 = arith.constant 0 : index
    %c2_105 = arith.constant 2 : index
    %62 = memref.load %arg5[%c0_104, %c2_105] : memref<1x4xf32, #tpu.memory_space<smem>>
    %c0_106 = arith.constant 0 : index
    %c3_107 = arith.constant 3 : index
    %63 = memref.load %arg5[%c0_106, %c3_107] : memref<1x4xf32, #tpu.memory_space<smem>>
    %c0_108 = arith.constant 0 : index
    %64 = memref.load %arg6[%c0_108] : memref<1xf32, #tpu.memory_space<smem>>
    %c0_i32 = arith.constant 0 : i32
    %c32_i32 = arith.constant 32 : i32
    %65 = arith.muli %c0_i32, %c32_i32 : i32
    %66 = tpu.assume_multiple %65, 32 : i32
    %c0_109 = arith.constant 0 : index
    %67 = arith.index_cast %66 : i32 to index
    %c0_110 = arith.constant 0 : index
    %68 = vector.load %arg7[%c0_109, %67, %c0_110] : memref<2x32x128xf32, #tpu.memory_space<vmem>>, vector<1x32x128xf32>
    %69 = vector.shape_cast %68 : vector<1x32x128xf32> to vector<32x128xf32>
    %c1_111 = arith.constant 1 : index
    %70 = arith.index_cast %66 : i32 to index
    %c0_112 = arith.constant 0 : index
    %71 = vector.load %arg7[%c1_111, %70, %c0_112] : memref<2x32x128xf32, #tpu.memory_space<vmem>>, vector<1x32x128xf32>
    %72 = vector.shape_cast %71 : vector<1x32x128xf32> to vector<32x128xf32>
    %73 = vector.broadcast %0 : f32 to vector<32x128xf32>
    %74 = arith.mulf %69, %73 : vector<32x128xf32>
    %75 = vector.broadcast %1 : f32 to vector<32x128xf32>
    %76 = arith.mulf %72, %75 : vector<32x128xf32>
    %77 = arith.addf %74, %76 : vector<32x128xf32>
    %78 = vector.broadcast %16 : f32 to vector<32x128xf32>
    %79 = arith.addf %77, %78 : vector<32x128xf32>
    %cst = arith.constant 0.000000e+00 : f32
    %80 = vector.broadcast %cst : f32 to vector<32x128xf32>
    %81 = arith.maximumf %79, %80 : vector<32x128xf32>
    %82 = vector.broadcast %24 : f32 to vector<32x128xf32>
    %83 = arith.mulf %81, %82 : vector<32x128xf32>
    %84 = vector.broadcast %32 : f32 to vector<32x128xf32>
    %85 = arith.mulf %81, %84 : vector<32x128xf32>
    %86 = vector.broadcast %40 : f32 to vector<32x128xf32>
    %87 = arith.mulf %81, %86 : vector<32x128xf32>
    %88 = vector.broadcast %48 : f32 to vector<32x128xf32>
    %89 = arith.mulf %81, %88 : vector<32x128xf32>
    %90 = vector.broadcast %2 : f32 to vector<32x128xf32>
    %91 = arith.mulf %69, %90 : vector<32x128xf32>
    %92 = vector.broadcast %3 : f32 to vector<32x128xf32>
    %93 = arith.mulf %72, %92 : vector<32x128xf32>
    %94 = arith.addf %91, %93 : vector<32x128xf32>
    %95 = vector.broadcast %17 : f32 to vector<32x128xf32>
    %96 = arith.addf %94, %95 : vector<32x128xf32>
    %cst_113 = arith.constant 0.000000e+00 : f32
    %97 = vector.broadcast %cst_113 : f32 to vector<32x128xf32>
    %98 = arith.maximumf %96, %97 : vector<32x128xf32>
    %99 = vector.broadcast %25 : f32 to vector<32x128xf32>
    %100 = arith.mulf %98, %99 : vector<32x128xf32>
    %101 = arith.addf %83, %100 : vector<32x128xf32>
    %102 = vector.broadcast %33 : f32 to vector<32x128xf32>
    %103 = arith.mulf %98, %102 : vector<32x128xf32>
    %104 = arith.addf %85, %103 : vector<32x128xf32>
    %105 = vector.broadcast %41 : f32 to vector<32x128xf32>
    %106 = arith.mulf %98, %105 : vector<32x128xf32>
    %107 = arith.addf %87, %106 : vector<32x128xf32>
    %108 = vector.broadcast %49 : f32 to vector<32x128xf32>
    %109 = arith.mulf %98, %108 : vector<32x128xf32>
    %110 = arith.addf %89, %109 : vector<32x128xf32>
    %111 = vector.broadcast %4 : f32 to vector<32x128xf32>
    %112 = arith.mulf %69, %111 : vector<32x128xf32>
    %113 = vector.broadcast %5 : f32 to vector<32x128xf32>
    %114 = arith.mulf %72, %113 : vector<32x128xf32>
    %115 = arith.addf %112, %114 : vector<32x128xf32>
    %116 = vector.broadcast %18 : f32 to vector<32x128xf32>
    %117 = arith.addf %115, %116 : vector<32x128xf32>
    %cst_114 = arith.constant 0.000000e+00 : f32
    %118 = vector.broadcast %cst_114 : f32 to vector<32x128xf32>
    %119 = arith.maximumf %117, %118 : vector<32x128xf32>
    %120 = vector.broadcast %26 : f32 to vector<32x128xf32>
    %121 = arith.mulf %119, %120 : vector<32x128xf32>
    %122 = arith.addf %101, %121 : vector<32x128xf32>
    %123 = vector.broadcast %34 : f32 to vector<32x128xf32>
    %124 = arith.mulf %119, %123 : vector<32x128xf32>
    %125 = arith.addf %104, %124 : vector<32x128xf32>
    %126 = vector.broadcast %42 : f32 to vector<32x128xf32>
    %127 = arith.mulf %119, %126 : vector<32x128xf32>
    %128 = arith.addf %107, %127 : vector<32x128xf32>
    %129 = vector.broadcast %50 : f32 to vector<32x128xf32>
    %130 = arith.mulf %119, %129 : vector<32x128xf32>
    %131 = arith.addf %110, %130 : vector<32x128xf32>
    %132 = vector.broadcast %6 : f32 to vector<32x128xf32>
    %133 = arith.mulf %69, %132 : vector<32x128xf32>
    %134 = vector.broadcast %7 : f32 to vector<32x128xf32>
    %135 = arith.mulf %72, %134 : vector<32x128xf32>
    %136 = arith.addf %133, %135 : vector<32x128xf32>
    %137 = vector.broadcast %19 : f32 to vector<32x128xf32>
    %138 = arith.addf %136, %137 : vector<32x128xf32>
    %cst_115 = arith.constant 0.000000e+00 : f32
    %139 = vector.broadcast %cst_115 : f32 to vector<32x128xf32>
    %140 = arith.maximumf %138, %139 : vector<32x128xf32>
    %141 = vector.broadcast %27 : f32 to vector<32x128xf32>
    %142 = arith.mulf %140, %141 : vector<32x128xf32>
    %143 = arith.addf %122, %142 : vector<32x128xf32>
    %144 = vector.broadcast %35 : f32 to vector<32x128xf32>
    %145 = arith.mulf %140, %144 : vector<32x128xf32>
    %146 = arith.addf %125, %145 : vector<32x128xf32>
    %147 = vector.broadcast %43 : f32 to vector<32x128xf32>
    %148 = arith.mulf %140, %147 : vector<32x128xf32>
    %149 = arith.addf %128, %148 : vector<32x128xf32>
    %150 = vector.broadcast %51 : f32 to vector<32x128xf32>
    %151 = arith.mulf %140, %150 : vector<32x128xf32>
    %152 = arith.addf %131, %151 : vector<32x128xf32>
    %153 = vector.broadcast %8 : f32 to vector<32x128xf32>
    %154 = arith.mulf %69, %153 : vector<32x128xf32>
    %155 = vector.broadcast %9 : f32 to vector<32x128xf32>
    %156 = arith.mulf %72, %155 : vector<32x128xf32>
    %157 = arith.addf %154, %156 : vector<32x128xf32>
    %158 = vector.broadcast %20 : f32 to vector<32x128xf32>
    %159 = arith.addf %157, %158 : vector<32x128xf32>
    %cst_116 = arith.constant 0.000000e+00 : f32
    %160 = vector.broadcast %cst_116 : f32 to vector<32x128xf32>
    %161 = arith.maximumf %159, %160 : vector<32x128xf32>
    %162 = vector.broadcast %28 : f32 to vector<32x128xf32>
    %163 = arith.mulf %161, %162 : vector<32x128xf32>
    %164 = arith.addf %143, %163 : vector<32x128xf32>
    %165 = vector.broadcast %36 : f32 to vector<32x128xf32>
    %166 = arith.mulf %161, %165 : vector<32x128xf32>
    %167 = arith.addf %146, %166 : vector<32x128xf32>
    %168 = vector.broadcast %44 : f32 to vector<32x128xf32>
    %169 = arith.mulf %161, %168 : vector<32x128xf32>
    %170 = arith.addf %149, %169 : vector<32x128xf32>
    %171 = vector.broadcast %52 : f32 to vector<32x128xf32>
    %172 = arith.mulf %161, %171 : vector<32x128xf32>
    %173 = arith.addf %152, %172 : vector<32x128xf32>
    %174 = vector.broadcast %10 : f32 to vector<32x128xf32>
    %175 = arith.mulf %69, %174 : vector<32x128xf32>
    %176 = vector.broadcast %11 : f32 to vector<32x128xf32>
    %177 = arith.mulf %72, %176 : vector<32x128xf32>
    %178 = arith.addf %175, %177 : vector<32x128xf32>
    %179 = vector.broadcast %21 : f32 to vector<32x128xf32>
    %180 = arith.addf %178, %179 : vector<32x128xf32>
    %cst_117 = arith.constant 0.000000e+00 : f32
    %181 = vector.broadcast %cst_117 : f32 to vector<32x128xf32>
    %182 = arith.maximumf %180, %181 : vector<32x128xf32>
    %183 = vector.broadcast %29 : f32 to vector<32x128xf32>
    %184 = arith.mulf %182, %183 : vector<32x128xf32>
    %185 = arith.addf %164, %184 : vector<32x128xf32>
    %186 = vector.broadcast %37 : f32 to vector<32x128xf32>
    %187 = arith.mulf %182, %186 : vector<32x128xf32>
    %188 = arith.addf %167, %187 : vector<32x128xf32>
    %189 = vector.broadcast %45 : f32 to vector<32x128xf32>
    %190 = arith.mulf %182, %189 : vector<32x128xf32>
    %191 = arith.addf %170, %190 : vector<32x128xf32>
    %192 = vector.broadcast %53 : f32 to vector<32x128xf32>
    %193 = arith.mulf %182, %192 : vector<32x128xf32>
    %194 = arith.addf %173, %193 : vector<32x128xf32>
    %195 = vector.broadcast %12 : f32 to vector<32x128xf32>
    %196 = arith.mulf %69, %195 : vector<32x128xf32>
    %197 = vector.broadcast %13 : f32 to vector<32x128xf32>
    %198 = arith.mulf %72, %197 : vector<32x128xf32>
    %199 = arith.addf %196, %198 : vector<32x128xf32>
    %200 = vector.broadcast %22 : f32 to vector<32x128xf32>
    %201 = arith.addf %199, %200 : vector<32x128xf32>
    %cst_118 = arith.constant 0.000000e+00 : f32
    %202 = vector.broadcast %cst_118 : f32 to vector<32x128xf32>
    %203 = arith.maximumf %201, %202 : vector<32x128xf32>
    %204 = vector.broadcast %30 : f32 to vector<32x128xf32>
    %205 = arith.mulf %203, %204 : vector<32x128xf32>
    %206 = arith.addf %185, %205 : vector<32x128xf32>
    %207 = vector.broadcast %38 : f32 to vector<32x128xf32>
    %208 = arith.mulf %203, %207 : vector<32x128xf32>
    %209 = arith.addf %188, %208 : vector<32x128xf32>
    %210 = vector.broadcast %46 : f32 to vector<32x128xf32>
    %211 = arith.mulf %203, %210 : vector<32x128xf32>
    %212 = arith.addf %191, %211 : vector<32x128xf32>
    %213 = vector.broadcast %54 : f32 to vector<32x128xf32>
    %214 = arith.mulf %203, %213 : vector<32x128xf32>
    %215 = arith.addf %194, %214 : vector<32x128xf32>
    %216 = vector.broadcast %14 : f32 to vector<32x128xf32>
    %217 = arith.mulf %69, %216 : vector<32x128xf32>
    %218 = vector.broadcast %15 : f32 to vector<32x128xf32>
    %219 = arith.mulf %72, %218 : vector<32x128xf32>
    %220 = arith.addf %217, %219 : vector<32x128xf32>
    %221 = vector.broadcast %23 : f32 to vector<32x128xf32>
    %222 = arith.addf %220, %221 : vector<32x128xf32>
    %cst_119 = arith.constant 0.000000e+00 : f32
    %223 = vector.broadcast %cst_119 : f32 to vector<32x128xf32>
    %224 = arith.maximumf %222, %223 : vector<32x128xf32>
    %225 = vector.broadcast %31 : f32 to vector<32x128xf32>
    %226 = arith.mulf %224, %225 : vector<32x128xf32>
    %227 = arith.addf %206, %226 : vector<32x128xf32>
    %228 = vector.broadcast %39 : f32 to vector<32x128xf32>
    %229 = arith.mulf %224, %228 : vector<32x128xf32>
    %230 = arith.addf %209, %229 : vector<32x128xf32>
    %231 = vector.broadcast %47 : f32 to vector<32x128xf32>
    %232 = arith.mulf %224, %231 : vector<32x128xf32>
    %233 = arith.addf %212, %232 : vector<32x128xf32>
    %234 = vector.broadcast %55 : f32 to vector<32x128xf32>
    %235 = arith.mulf %224, %234 : vector<32x128xf32>
    %236 = arith.addf %215, %235 : vector<32x128xf32>
    %237 = vector.broadcast %56 : f32 to vector<32x128xf32>
    %238 = arith.addf %227, %237 : vector<32x128xf32>
    %cst_120 = arith.constant 0.000000e+00 : f32
    %239 = vector.broadcast %cst_120 : f32 to vector<32x128xf32>
    %240 = arith.maximumf %238, %239 : vector<32x128xf32>
    %241 = vector.broadcast %60 : f32 to vector<32x128xf32>
    %242 = arith.mulf %240, %241 : vector<32x128xf32>
    %243 = vector.broadcast %57 : f32 to vector<32x128xf32>
    %244 = arith.addf %230, %243 : vector<32x128xf32>
    %cst_121 = arith.constant 0.000000e+00 : f32
    %245 = vector.broadcast %cst_121 : f32 to vector<32x128xf32>
    %246 = arith.maximumf %244, %245 : vector<32x128xf32>
    %247 = vector.broadcast %61 : f32 to vector<32x128xf32>
    %248 = arith.mulf %246, %247 : vector<32x128xf32>
    %249 = arith.addf %242, %248 : vector<32x128xf32>
    %250 = vector.broadcast %58 : f32 to vector<32x128xf32>
    %251 = arith.addf %233, %250 : vector<32x128xf32>
    %cst_122 = arith.constant 0.000000e+00 : f32
    %252 = vector.broadcast %cst_122 : f32 to vector<32x128xf32>
    %253 = arith.maximumf %251, %252 : vector<32x128xf32>
    %254 = vector.broadcast %62 : f32 to vector<32x128xf32>
    %255 = arith.mulf %253, %254 : vector<32x128xf32>
    %256 = arith.addf %249, %255 : vector<32x128xf32>
    %257 = vector.broadcast %59 : f32 to vector<32x128xf32>
    %258 = arith.addf %236, %257 : vector<32x128xf32>
    %cst_123 = arith.constant 0.000000e+00 : f32
    %259 = vector.broadcast %cst_123 : f32 to vector<32x128xf32>
    %260 = arith.maximumf %258, %259 : vector<32x128xf32>
    %261 = vector.broadcast %63 : f32 to vector<32x128xf32>
    %262 = arith.mulf %260, %261 : vector<32x128xf32>
    %263 = arith.addf %256, %262 : vector<32x128xf32>
    %264 = vector.broadcast %64 : f32 to vector<32x128xf32>
    %265 = arith.addf %263, %264 : vector<32x128xf32>
    %266 = arith.index_cast %66 : i32 to index
    %c0_124 = arith.constant 0 : index
    %267 = vector.load %arg8[%266, %c0_124] : memref<32x128xf32, #tpu.memory_space<vmem>>, vector<32x128xf32>
    tpu.vector_store %arg8[%266, %c0_124], %265 {strides = array<i32>} : memref<32x128xf32, #tpu.memory_space<vmem>>, vector<32x128xf32>,
    %c1_i32 = arith.constant 1 : i32
    return
  }
  func.func @transform_0(%arg0: i32) -> (i32, i32) {
    %c0_i32 = arith.constant 0 : i32
    %c0_i32_0 = arith.constant 0 : i32
    %c0_i32_1 = arith.constant 0 : i32
    return %c0_i32, %c0_i32_0 : i32, i32
  }
  func.func @transform_1(%arg0: i32) -> i32 {
    %c0_i32 = arith.constant 0 : i32
    %c0_i32_0 = arith.constant 0 : i32
    return %c0_i32 : i32
  }
  func.func @transform_2(%arg0: i32) -> (i32, i32) {
    %c0_i32 = arith.constant 0 : i32
    %c0_i32_0 = arith.constant 0 : i32
    %c0_i32_1 = arith.constant 0 : i32
    return %c0_i32, %c0_i32_0 : i32, i32
  }
  func.func @transform_3(%arg0: i32) -> i32 {
    %c0_i32 = arith.constant 0 : i32
    %c0_i32_0 = arith.constant 0 : i32
    return %c0_i32 : i32
  }
  func.func @transform_4(%arg0: i32) -> (i32, i32) {
    %c0_i32 = arith.constant 0 : i32
    %c0_i32_0 = arith.constant 0 : i32
    %c0_i32_1 = arith.constant 0 : i32
    return %c0_i32, %c0_i32_0 : i32, i32
  }
  func.func @transform_5(%arg0: i32) -> i32 {
    %c0_i32 = arith.constant 0 : i32
    %c0_i32_0 = arith.constant 0 : i32
    return %c0_i32 : i32
  }
  func.func @transform_6(%arg0: i32) -> (i32, i32, i32) {
    %c0_i32 = arith.constant 0 : i32
    %c0_i32_0 = arith.constant 0 : i32
    %c0_i32_1 = arith.constant 0 : i32
    return %c0_i32, %arg0, %c0_i32_0 : i32, i32, i32
  }
  func.func @transform_7(%arg0: i32) -> (i32, i32) {
    %c0_i32 = arith.constant 0 : i32
    %c0_i32_0 = arith.constant 0 : i32
    return %arg0, %c0_i32 : i32, i32
  }
}

</mosaic_0001>

<bundles_post_ra>
// kernel: advanced_net_forward.1
= control target key start
LH: loop header
LB: loop body
LE: loop exit
PB: predicated region body
PF: predicated region fallthrough
CT: control target
= control target key end

     0   :  { %13 = vsyncpa [#allocation4], 0  ;;  %s1465_s0 = inlined_call_operand.vmem [shape: f32[8,2], index: 0, kind: input, shape index: {}]   ;;  %s1466_s1 = inlined_call_operand.vmem [shape: f32[8], index: 1, kind: input, shape index: {}]   ;;  %s1467_s2 = inlined_call_operand.vmem [shape: f32[4,8], index: 2, kind: input, shape index: {}]   ;;  %s1468_s3 = inlined_call_operand.vmem [shape: f32[4], index: 3, kind: input, shape index: {}]   ;;  %s1469_s4 = inlined_call_operand.vmem [shape: f32[1,4], index: 4, kind: input, shape index: {}]   ;;  %s1470_s5 = inlined_call_operand.<no memory space> [shape: f32[1], index: 5, kind: input, shape index: {}]   ;;  %s1471_s6 = inlined_call_operand.vmem [shape: f32[2,32,128], index: 6, kind: input, shape index: {}]   ;;  %s1472_s7 = inlined_call_operand.vmem [shape: f32[32,128], index: 7, kind: output, shape index: {}]  }
   0x1   :  { %14 = vsyncpa [#allocation6], 0  ;;  %s32_s26 = sshll.u32 %s1466_s1, 4  ;;  %s33_s26 = int_to_ptr.vmem [resolvable:$true] %s32_s26 }
   0x2   :  { %15 = vsyncpa [#allocation9], 0  ;;  %s52_s29 = sshll.u32 %s1468_s3, 4  ;;  %s770_s30 = scalar_lea.vmem %s33_s26, 16  ;;  %s53_s29 = int_to_ptr.vmem [resolvable:$true] %s52_s29 }
   0x3   :  { %p771_p0 = scmp.ne.s32.totalorder %s33_s26, %s770_s30  ;;  %p775_p1 = scmp.lt.s32.totalorder %s33_s26, %s33_s26 }
   0x4   :  { %p776_p2 = scmp.lt.s32.totalorder %s770_s30, %s770_s30 }
   0x6   :  { %p777_p3 = por %p776_p2, %p775_p1 }
   0x8   :  { %p778_p4 = pnand %p777_p3, %p771_p0 }
   0xa   :  { %781 = shalt.err (!%p778_p4)
}
   0xb   :  { %s836_s8 = smov [#allocation5]   ;;  %s782_s9 = scalar_lea.vmem %s53_s29, 16 }
   0xc   :  { %35 = dma.vmem_to_smem %s33_s26, 16, %s836_s8, [#allocation6]  }
   0xd   :  { %p783_p5 = scmp.ne.s32.totalorder %s53_s29, %s782_s9  ;;  %p787_p6 = scmp.lt.s32.totalorder %s53_s29, %s53_s29 }
   0xe   :  { %p788_p7 = scmp.lt.s32.totalorder %s782_s9, %s782_s9 }
  0x10   :  { %p789_p8 = por %p788_p7, %p787_p6 }
  0x12   :  { %p790_p9 = pnand %p789_p8, %p783_p5 }
  0x14   :  { %793 = shalt.err (!%p790_p9)
}
  0x15   :  { %s837_s1 = smov [#allocation8]   ;;  %s22_s11 = sshll.u32 %s1465_s0, 4  ;;  %s23_s11 = int_to_ptr.vmem [resolvable:$true] %s22_s11 }
  0x16   :  { %55 = dma.vmem_to_smem %s53_s29, 16, %s837_s1, [#allocation9]  }
  0x17   :  { %s42_s14 = sshll.u32 %s1467_s2, 4  ;;  %s794_s15 = scalar_lea.vmem %s23_s11, 128  ;;  %s43_s14 = int_to_ptr.vmem [resolvable:$true] %s42_s14 }
  0x18   :  { %p795_p10 = scmp.ne.s32.totalorder %s23_s11, %s794_s15  ;;  %p799_p11 = scmp.lt.s32.totalorder %s23_s11, %s23_s11 }
  0x19   :  { %p800_p12 = scmp.lt.s32.totalorder %s794_s15, %s794_s15 }
  0x1b   :  { %p801_p13 = por %p800_p12, %p799_p11 }
  0x1d   :  { %p802_p0 = pnand %p801_p13, %p795_p10 }
  0x1f   :  { %805 = shalt.err (!%p802_p0)
}
  0x20   :  { %s838_s16 = smov [#allocation3]   ;;  %s806_s17 = scalar_lea.vmem %s43_s14, 64 }
  0x21   :  { %25 = dma.vmem_to_smem %s23_s11, 128, %s838_s16, [#allocation4]  }
  0x22   :  { %p807_p1 = scmp.ne.s32.totalorder %s43_s14, %s806_s17  ;;  %p811_p2 = scmp.lt.s32.totalorder %s43_s14, %s43_s14 }
  0x23   :  { %p812_p3 = scmp.lt.s32.totalorder %s806_s17, %s806_s17 }
  0x25   :  { %p813_p4 = por %p812_p3, %p811_p2 }
  0x27   :  { %p814_p5 = pnand %p813_p4, %p807_p1 }
  0x29   :  { %817 = shalt.err (!%p814_p5)
}
  0x2a   :  { %s839_s0 = smov [#allocation7]   ;;  %s62_s19 = sshll.u32 %s1469_s4, 4  ;;  %s63_s19 = int_to_ptr.vmem [resolvable:$true] %s62_s19 }
  0x2b   :  { %45 = dma.vmem_to_smem %s43_s14, 64, %s839_s0, [#allocation6]  }
  0x2c   :  { %s818_s20 = scalar_lea.vmem %s63_s19, 16  ;;  %p823_p7 = scmp.lt.s32.totalorder %s63_s19, %s63_s19 }
  0x2d   :  { %p819_p6 = scmp.ne.s32.totalorder %s63_s19, %s818_s20  ;;  %p824_p8 = scmp.lt.s32.totalorder %s818_s20, %s818_s20 }
  0x2f   :  { %p825_p9 = por %p824_p8, %p823_p7 }
  0x31   :  { %p826_p10 = pnand %p825_p9, %p819_p6 }
  0x33   :  { %829 = shalt.err (!%p826_p10)
}
  0x34   :  { %s840_s21 = smov [#allocation10]  }
  0x35   :  { %65 = dma.vmem_to_smem %s63_s19, 16, %s840_s21, [#allocation9]  }
  0x36   :  { %830 = dma.done.wait [#allocation4], 128  }
  0x37   :  { %831 = vsyncadd [#allocation4], 4294967168 }
  0x38   :  { %832 = dma.done.wait [#allocation6], 80  }
  0x39   :  { %833 = vsyncadd [#allocation6], 4294967216 }
  0x3a   :  { %834 = dma.done.wait [#allocation9], 32  }
  0x3b   :  { %835 = vsyncadd [#allocation9], 4294967264 }
  0x3c   :  { %85 = sfence }
  0x3d   :  { %s86_s22 = sld [smem:[#allocation3]]  ;;  %v901_v0 = vld [vmem:[%s1471_s6] sm:$0xff]  ;;  %v908_v1 = vld [vmem:[%s1471_s6 + $0x8] sm:$0xff]  ;;  %v913_v2 = vld [vmem:[%s1471_s6 + $0x10] sm:$0xff] }
  0x3e   :  { %s702_s23 = sld [smem:[#allocation3 + $0x1]]  ;;  %v918_v3 = vld [vmem:[%s1471_s6 + $0x18] sm:$0xff]  ;;  %v925_v4 = vld [vmem:[%s1471_s6 + $0x20] sm:$0xff]  ;;  %v932_v5 = vld [vmem:[%s1471_s6 + $0x28] sm:$0xff] }
  0x3f   :  { %s703_s4 = sld [smem:[#allocation3 + $0x80]]  ;;  %1479 = vst [vmem:[#allocation14_spill] sm:$0xff] %v925_v4  ;;  %1480 = vst [vmem:[#allocation15_spill] sm:$0xff] %v932_v5  ;;  %v937_v6 = vld [vmem:[%s1471_s6 + $0x30] sm:$0xff]  ;;  %v942_v7 = vld [vmem:[%s1471_s6 + $0x38] sm:$0xff] }
  0x40   :  { %s896_s24 = sld [smem:[#allocation3 + $0x81]]  ;;  %1481 = vst [vmem:[#allocation16_spill] sm:$0xff] %v937_v6 }
  0x41   :  { %s903_s27 = sld [smem:[#allocation3 + $0x100]] }
  0x42   :  { %s920_s3 = sld [smem:[#allocation3 + $0x101]] }
  0x43   :  { %s927_s12 = sld [smem:[#allocation3 + $0x180]]  ;;  %v161_v8 = vstv %s86_s22 }
  0x44   :  { %v162_v9 = vmul.f32 %v161_v8, %v901_v0  ;;  %v163_v10 = vmul.f32 %v161_v8, %v908_v1  ;;  %v164_v11 = vmul.f32 %v161_v8, %v913_v2  ;;  %v165_v12 = vmul.f32 %v161_v8, %v918_v3  ;;  %s948_s2 = sld [smem:[#allocation3 + $0x181]] }
  0x45   :  { %v166_v13 = vstv %s702_s23  ;;  %v204_v14 = vstv %s703_s4  ;;  %s950_s18 = sld [smem:[#allocation3 + $0x200]] }
  0x46   :  { %v167_v15 = vmul.f32 %v925_v4, %v166_v13  ;;  %v168_v16 = vmul.f32 %v932_v5, %v166_v13  ;;  %v169_v17 = vmul.f32 %v937_v6, %v166_v13  ;;  %v170_v18 = vmul.f32 %v942_v7, %v166_v13  ;;  %s956_s6 = sld [smem:[#allocation3 + $0x201]] }
  0x47   :  { %v205_v19 = vmul.f32 %v204_v14, %v901_v0  ;;  %v206_v20 = vmul.f32 %v204_v14, %v908_v1  ;;  %v207_v21 = vmul.f32 %v204_v14, %v913_v2  ;;  %v208_v22 = vmul.f32 %v204_v14, %v918_v3  ;;  %s962_s19 = sld [smem:[#allocation3 + $0x280]] }
  0x48   :  { %v171_v23 = vadd.f32 %v167_v15, %v162_v9  ;;  %v172_v24 = vadd.f32 %v168_v16, %v163_v10  ;;  %v173_v25 = vadd.f32 %v169_v17, %v164_v11  ;;  %v174_v26 = vadd.f32 %v170_v18, %v165_v12  ;;  %s102_s20 = sld [smem:[#allocation5]] }
  0x49   :  { %v209_v27 = vstv %s896_s24  ;;  %v263_v28 = vstv %s903_s27  ;;  %v268_v29 = vstv %s920_s3  ;;  %v322_v30 = vstv %s927_s12  ;;  %s980_s21 = sld [smem:[#allocation5 + $0x1]] }
  0x4a   :  { %v210_v31 = vmul.f32 %v925_v4, %v209_v27  ;;  %v211_v32 = vmul.f32 %v932_v5, %v209_v27  ;;  %v212_v33 = vmul.f32 %v937_v6, %v209_v27  ;;  %v213_v34 = vmul.f32 %v942_v7, %v209_v27  ;;  %s718_s22 = sld [smem:[#allocation5 + $0x2]] }
  0x4b   :  { %v264_v35 = vmul.f32 %v263_v28, %v901_v0  ;;  %v265_v36 = vmul.f32 %v263_v28, %v908_v1  ;;  %v266_v37 = vmul.f32 %v263_v28, %v913_v2  ;;  %v267_v38 = vmul.f32 %v263_v28, %v918_v3  ;;  %s1010_s23 = sld [smem:[#allocation5 + $0x3]] }
  0x4c   :  { %v214_v39 = vadd.f32 %v210_v31, %v205_v19  ;;  %v215_v40 = vadd.f32 %v211_v32, %v206_v20  ;;  %v216_v41 = vadd.f32 %v212_v33, %v207_v21  ;;  %v217_v42 = vadd.f32 %v213_v34, %v208_v22  ;;  %s110_s4 = sld [smem:[#allocation7]] }
  0x4d   :  { %v269_v43 = vmul.f32 %v925_v4, %v268_v29  ;;  %v270_v44 = vmul.f32 %v932_v5, %v268_v29  ;;  %v271_v45 = vmul.f32 %v937_v6, %v268_v29  ;;  %v272_v46 = vmul.f32 %v942_v7, %v268_v29  ;;  %s1017_s24 = sld [smem:[#allocation7 + $0x1]] }
  0x4e   :  { %v323_v47 = vmul.f32 %v322_v30, %v901_v0  ;;  %v324_v48 = vmul.f32 %v322_v30, %v908_v1  ;;  %v325_v49 = vmul.f32 %v322_v30, %v913_v2  ;;  %v326_v50 = vmul.f32 %v322_v30, %v918_v3  ;;  %s725_s25 = sld [smem:[#allocation7 + $0x2]] }
  0x4f   :  { %v273_v51 = vadd.f32 %v269_v43, %v264_v35  ;;  %v274_v52 = vadd.f32 %v270_v44, %v265_v36  ;;  %v275_v53 = vadd.f32 %v271_v45, %v266_v37  ;;  %v276_v54 = vadd.f32 %v272_v46, %v267_v38  ;;  %s1043_s26 = sld [smem:[#allocation7 + $0x3]] }
  0x50   :  { %v327_v55 = vstv %s948_s2  ;;  %v381_v56 = vstv %s950_s18  ;;  %v989_v57 = vstv %s956_s6  ;;  %v992_v58 = vstv %s962_s19  ;;  %s731_s27 = sld [smem:[#allocation7 + $0x80]] }
  0x51   :  { %v328_v59 = vmul.f32 %v925_v4, %v327_v55  ;;  %v329_v60 = vmul.f32 %v932_v5, %v327_v55  ;;  %v330_v61 = vmul.f32 %v937_v6, %v327_v55  ;;  %v331_v62 = vmul.f32 %v942_v7, %v327_v55  ;;  %s1059_s28 = sld [smem:[#allocation7 + $0x81]] }
  0x52   :  { %v999_v63 = vmul.f32 %v381_v56, %v901_v0  ;;  %v1002_v8 = vmul.f32 %v381_v56, %v908_v1  ;;  %v1005_v9 = vmul.f32 %v381_v56, %v913_v2  ;;  %v1008_v10 = vmul.f32 %v381_v56, %v918_v3  ;;  %s733_s29 = sld [smem:[#allocation7 + $0x82]] }
  0x53   :  { %v175_v11 = vstv %s102_s20  ;;  %v332_v12 = vadd.f32 %v328_v59, %v323_v47  ;;  %v333_v13 = vadd.f32 %v329_v60, %v324_v48  ;;  %v334_v14 = vadd.f32 %v330_v61, %v325_v49  ;;  %s1073_s30 = sld [smem:[#allocation7 + $0x83]] }
  0x54   :  { %v176_v15 = vadd.f32 %v175_v11, %v171_v23  ;;  %v177_v16 = vadd.f32 %v175_v11, %v172_v24  ;;  %v178_v17 = vadd.f32 %v175_v11, %v173_v25  ;;  %v179_v18 = vadd.f32 %v175_v11, %v174_v26  ;;  %s739_s8 = sld [smem:[#allocation7 + $0x100]] }
  0x55   :  { %v218_v19 = vstv %s980_s21  ;;  %v277_v20 = vstv %s718_s22  ;;  %v335_v21 = vadd.f32 %v331_v62, %v326_v50  ;;  %v1015_v22 = vmul.f32 %v925_v4, %v989_v57  ;;  %s1087_s9 = sld [smem:[#allocation7 + $0x101]] }
  0x56   :  { %v1019_v27 = vmax.f32 %v176_v15, 0.0  ;;  %v1021_v28 = vmax.f32 %v177_v16, 0.0  ;;  %v1023_v29 = vmax.f32 %v178_v17, 0.0  ;;  %v1025_v23 = vmax.f32 %v179_v18, 0.0  ;;  %s741_s1 = sld [smem:[#allocation7 + $0x102]] }
  0x57   :  { %v219_v24 = vadd.f32 %v218_v19, %v214_v39  ;;  %v220_v25 = vadd.f32 %v218_v19, %v215_v40  ;;  %v221_v26 = vadd.f32 %v218_v19, %v216_v41  ;;  %v222_v30 = vadd.f32 %v218_v19, %v217_v42  ;;  %s1103_s3 = sld [smem:[#allocation7 + $0x103]] }
  0x58   :  { %v278_v31 = vadd.f32 %v277_v20, %v273_v51  ;;  %v279_v32 = vadd.f32 %v277_v20, %v274_v52  ;;  %v280_v33 = vadd.f32 %v277_v20, %v275_v53  ;;  %v281_v34 = vadd.f32 %v277_v20, %v276_v54  ;;  %s747_s10 = sld [smem:[#allocation7 + $0x180]] }
  0x59   :  { %v1027_v35 = vmax.f32 %v219_v24, 0.0  ;;  %v1029_v36 = vmax.f32 %v220_v25, 0.0  ;;  %v1031_v37 = vmax.f32 %v221_v26, 0.0  ;;  %v1033_v38 = vmax.f32 %v222_v30, 0.0  ;;  %s1117_s11 = sld [smem:[#allocation7 + $0x181]] }
  0x5a   :  { %v1035_v43 = vmax.f32 %v278_v31, 0.0  ;;  %v1037_v39 = vmax.f32 %v279_v32, 0.0  ;;  %v1039_v40 = vmax.f32 %v280_v33, 0.0  ;;  %v1041_v41 = vmax.f32 %v281_v34, 0.0  ;;  %s749_s12 = sld [smem:[#allocation7 + $0x182]] }
  0x5b   :  { %v184_v42 = vstv %s110_s4  ;;  %v336_v44 = vstv %s1010_s23  ;;  %v1048_v45 = vmul.f32 %v932_v5, %v989_v57  ;;  %v1052_v46 = vmul.f32 %v937_v6, %v989_v57  ;;  %s1133_s13 = sld [smem:[#allocation7 + $0x183]] }
  0x5c   :  { %v185_v47 = vmul.f32 %v184_v42, %v1019_v27  ;;  %v186_v48 = vmul.f32 %v184_v42, %v1021_v28  ;;  %v187_v49 = vmul.f32 %v184_v42, %v1023_v29  ;;  %v188_v50 = vmul.f32 %v184_v42, %v1025_v23  ;;  %s1140_s14 = sld [smem:[#allocation5 + $0x4]] }
  0x5d   :  { %v227_v51 = vstv %s1017_s24  ;;  %v286_v52 = vstv %s725_s25  ;;  %v337_v53 = vadd.f32 %v336_v44, %v332_v12  ;;  %v338_v54 = vadd.f32 %v336_v44, %v333_v13  ;;  %s1146_s15 = sld [smem:[#allocation7 + $0x4]] }
  0x5e   :  { %v228_v55 = vmul.f32 %v227_v51, %v1027_v35  ;;  %v229_v56 = vmul.f32 %v227_v51, %v1029_v36  ;;  %v230_v59 = vmul.f32 %v227_v51, %v1031_v37  ;;  %v231_v60 = vmul.f32 %v227_v51, %v1033_v38  ;;  %s1151_s16 = sld [smem:[#allocation7 + $0x84]] }
  0x5f   :  { %v287_v61 = vmul.f32 %v286_v52, %v1035_v43  ;;  %v288_v62 = vmul.f32 %v286_v52, %v1037_v39  ;;  %v289_v11 = vmul.f32 %v286_v52, %v1039_v40  ;;  %v290_v12 = vmul.f32 %v286_v52, %v1041_v41  ;;  %s1157_s17 = sld [smem:[#allocation7 + $0x104]] }
  0x60   :  { %v232_v13 = vadd.f32 %v228_v55, %v185_v47  ;;  %v233_v15 = vadd.f32 %v229_v56, %v186_v48  ;;  %v234_v16 = vadd.f32 %v230_v59, %v187_v49  ;;  %v235_v17 = vadd.f32 %v231_v60, %v188_v50  ;;  %s1163_s0 = sld [smem:[#allocation3 + $0x281]] }
  0x61   :  { %v339_v18 = vadd.f32 %v336_v44, %v334_v14  ;;  %v340_v19 = vadd.f32 %v336_v44, %v335_v21  ;;  %v1069_v20 = vmax.f32 %v337_v53, 0.0  ;;  %v1071_v24 = vmax.f32 %v338_v54, 0.0  ;;  %s1165_s2 = sld [smem:[#allocation7 + $0x184]] }
  0x62   :  { %v291_v25 = vadd.f32 %v287_v61, %v232_v13  ;;  %v292_v26 = vadd.f32 %v288_v62, %v233_v15  ;;  %v293_v30 = vadd.f32 %v289_v11, %v234_v16  ;;  %v294_v31 = vadd.f32 %v290_v12, %v235_v17  ;;  %s1173_s18 = sld [smem:[#allocation5 + $0x5]] }
  0x63   :  { %v189_v32 = vstv %s731_s27  ;;  %v1075_v33 = vmax.f32 %v339_v18, 0.0  ;;  %v1077_v34 = vmax.f32 %v340_v19, 0.0  ;;  %v345_v42 = vstv %s1043_s26  ;;  %s1175_s6 = sld [smem:[#allocation7 + $0x5]] }
  0x64   :  { %v190_v14 = vmul.f32 %v189_v32, %v1019_v27  ;;  %v191_v21 = vmul.f32 %v189_v32, %v1021_v28  ;;  %v192_v44 = vmul.f32 %v189_v32, %v1023_v29  ;;  %v193_v47 = vmul.f32 %v189_v32, %v1025_v23  ;;  %s1206_s19 = sld [smem:[#allocation3 + $0x300]] }
  0x65   :  { %v236_v48 = vstv %s1059_s28  ;;  %v295_v49 = vstv %s733_s29  ;;  %v346_v50 = vmul.f32 %v345_v42, %v1069_v20  ;;  %v347_v51 = vmul.f32 %v345_v42, %v1071_v24  ;;  %s1208_s20 = sld [smem:[#allocation7 + $0x85]] }
  0x66   :  { %v237_v52 = vmul.f32 %v236_v48, %v1027_v35  ;;  %v238_v53 = vmul.f32 %v236_v48, %v1029_v36  ;;  %v239_v54 = vmul.f32 %v236_v48, %v1031_v37  ;;  %v240_v55 = vmul.f32 %v236_v48, %v1033_v38  ;;  %s1217_s21 = sld [smem:[#allocation7 + $0x105]] }
  0x67   :  { %v296_v56 = vmul.f32 %v295_v49, %v1035_v43  ;;  %v297_v59 = vmul.f32 %v295_v49, %v1037_v39  ;;  %v298_v60 = vmul.f32 %v295_v49, %v1039_v40  ;;  %v299_v61 = vmul.f32 %v295_v49, %v1041_v41  ;;  %s1219_s22 = sld [smem:[#allocation7 + $0x185]] }
  0x68   :  { %v241_v62 = vadd.f32 %v237_v52, %v190_v14  ;;  %v242_v11 = vadd.f32 %v238_v53, %v191_v21  ;;  %v243_v12 = vadd.f32 %v239_v54, %v192_v44  ;;  %v244_v13 = vadd.f32 %v240_v55, %v193_v47  ;;  %s1221_s23 = sld [smem:[#allocation3 + $0x301]] }
  0x69   :  { %v348_v15 = vmul.f32 %v345_v42, %v1075_v33  ;;  %v349_v16 = vmul.f32 %v345_v42, %v1077_v34  ;;  %v1099_v17 = vadd.f32 %v346_v50, %v291_v25  ;;  %v1101_v18 = vadd.f32 %v347_v51, %v292_v26  ;;  %s1235_s4 = sld [smem:[#allocation5 + $0x6]] }
  0x6a   :  { %v300_v19 = vadd.f32 %v296_v56, %v241_v62  ;;  %v301_v32 = vadd.f32 %v297_v59, %v242_v11  ;;  %v302_v48 = vadd.f32 %v298_v60, %v243_v12  ;;  %v303_v6 = vadd.f32 %v299_v61, %v244_v13  ;;  %s1249_s24 = sld [smem:[#allocation7 + $0x6]] }
  0x6b   :  { %v194_v14 = vstv %s739_s8  ;;  %v1105_v49 = vadd.f32 %v348_v15, %v293_v30  ;;  %v1107_v21 = vadd.f32 %v349_v16, %v294_v31  ;;  %v354_v44 = vstv %s1073_s30  ;;  %s1251_s25 = sld [smem:[#allocation7 + $0x86]] }
  0x6c   :  { %v195_v47 = vmul.f32 %v194_v14, %v1019_v27  ;;  %v196_v25 = vmul.f32 %v194_v14, %v1021_v28  ;;  %v197_v42 = vmul.f32 %v194_v14, %v1023_v29  ;;  %v198_v26 = vmul.f32 %v194_v14, %v1025_v23  ;;  %s1293_s26 = sld [smem:[#allocation3 + $0x380]] }
  0x6d   :  { %1482 = vst [vmem:[#allocation17_spill] sm:$0xff] %v1105_v49  ;;  %1483 = vst [vmem:[#allocation18_spill] sm:$0xff] %v1107_v21  ;;  %v245_v50 = vstv %s1087_s9  ;;  %v304_v51 = vstv %s741_s1  ;;  %v355_v52 = vmul.f32 %v354_v44, %v1069_v20  ;;  %v356_v53 = vmul.f32 %v354_v44, %v1071_v24  ;;  %s1295_s27 = sld [smem:[#allocation3 + $0x381]] }
  0x6e   :  { %v246_v30 = vmul.f32 %v245_v50, %v1027_v35  ;;  %v247_v31 = vmul.f32 %v245_v50, %v1029_v36  ;;  %v248_v54 = vmul.f32 %v245_v50, %v1031_v37  ;;  %v249_v55 = vmul.f32 %v245_v50, %v1033_v38  ;;  %s1301_s28 = sld [smem:[#allocation7 + $0x106]] }
  0x6f   :  { %v305_v56 = vmul.f32 %v304_v51, %v1035_v43  ;;  %v306_v59 = vmul.f32 %v304_v51, %v1037_v39  ;;  %v307_v60 = vmul.f32 %v304_v51, %v1039_v40  ;;  %v308_v61 = vmul.f32 %v304_v51, %v1041_v41  ;;  %s1307_s29 = sld [smem:[#allocation7 + $0x186]] }
  0x70   :  { %v250_v62 = vadd.f32 %v246_v30, %v195_v47  ;;  %v251_v11 = vadd.f32 %v247_v31, %v196_v25  ;;  %v252_v12 = vadd.f32 %v248_v54, %v197_v42  ;;  %v253_v13 = vadd.f32 %v249_v55, %v198_v26  ;;  %s1357_s30 = sld [smem:[#allocation5 + $0x7]] }
  0x71   :  { %v357_v15 = vmul.f32 %v354_v44, %v1075_v33  ;;  %v358_v16 = vmul.f32 %v354_v44, %v1077_v34  ;;  %v1129_v14 = vadd.f32 %v355_v52, %v300_v19  ;;  %v1131_v50 = vadd.f32 %v356_v53, %v301_v32  ;;  %s1359_s8 = sld [smem:[#allocation7 + $0x7]] }
  0x72   :  { %v309_v5 = vadd.f32 %v305_v56, %v250_v62  ;;  %v310_v4 = vadd.f32 %v306_v59, %v251_v11  ;;  %v311_v21 = vadd.f32 %v307_v60, %v252_v12  ;;  %v312_v49 = vadd.f32 %v308_v61, %v253_v13  ;;  %s1365_s9 = sld [smem:[#allocation7 + $0x87]] }
  0x73   :  { %v199_v47 = vstv %s747_s10  ;;  %v1135_v51 = vadd.f32 %v357_v15, %v302_v48  ;;  %v1137_v25 = vadd.f32 %v358_v16, %v303_v6  ;;  %v363_v42 = vstv %s1103_s3  ;;  %s1367_s1 = sld [smem:[#allocation7 + $0x107]] }
  0x74   :  { %v200_v19 = vmul.f32 %v199_v47, %v1019_v27  ;;  %v201_v32 = vmul.f32 %v199_v47, %v1021_v28  ;;  %v202_v44 = vmul.f32 %v199_v47, %v1023_v29  ;;  %v203_v26 = vmul.f32 %v199_v47, %v1025_v23  ;;  %s1373_s3 = sld [smem:[#allocation7 + $0x187]] }
  0x75   :  { %v254_v52 = vstv %s1117_s11  ;;  %v313_v53 = vstv %s749_s12  ;;  %v364_v48 = vmul.f32 %v363_v42, %v1069_v20  ;;  %v365_v6 = vmul.f32 %v363_v42, %v1071_v24  ;;  %s1375_s10 = sld [smem:[#allocation8]] }
  0x76   :  { %v255_v30 = vmul.f32 %v254_v52, %v1027_v35  ;;  %v256_v27 = vmul.f32 %v254_v52, %v1029_v36  ;;  %v257_v28 = vmul.f32 %v254_v52, %v1031_v37  ;;  %v258_v29 = vmul.f32 %v254_v52, %v1033_v38  ;;  %s1381_s11 = sld [smem:[#allocation8 + $0x1]] }
  0x77   :  { %v314_v23 = vmul.f32 %v313_v53, %v1035_v43  ;;  %v315_v31 = vmul.f32 %v313_v53, %v1037_v39  ;;  %v316_v54 = vmul.f32 %v313_v53, %v1039_v40  ;;  %v317_v55 = vmul.f32 %v313_v53, %v1041_v41  ;;  %s1387_s12 = sld [smem:[#allocation8 + $0x2]] }
  0x78   :  { %v259_v56 = vadd.f32 %v255_v30, %v200_v19  ;;  %v260_v35 = vadd.f32 %v256_v27, %v201_v32  ;;  %v261_v36 = vadd.f32 %v257_v28, %v202_v44  ;;  %v262_v59 = vadd.f32 %v258_v29, %v203_v26 }
  0x79   :  { %v366_v37 = vmul.f32 %v363_v42, %v1075_v33  ;;  %v367_v38 = vmul.f32 %v363_v42, %v1077_v34  ;;  %v1169_v43 = vadd.f32 %v364_v48, %v309_v5  ;;  %v1171_v39 = vadd.f32 %v365_v6, %v310_v4 }
  0x7a   :  { %v318_v40 = vadd.f32 %v314_v23, %v259_v56  ;;  %v319_v41 = vadd.f32 %v315_v31, %v260_v35  ;;  %v320_v60 = vadd.f32 %v316_v54, %v261_v36  ;;  %v321_v61 = vadd.f32 %v317_v55, %v262_v59 }
  0x7b   :  { %v1177_v62 = vadd.f32 %v366_v37, %v311_v21  ;;  %v1179_v11 = vadd.f32 %v367_v38, %v312_v49  ;;  %v372_v12 = vstv %s1133_s13  ;;  %v390_v4 = vmul.f32 %v942_v7, %v989_v57  ;;  %v1484_v38 = vld [vmem:[#allocation17_spill] sm:$0xff]  ;;  %s1393_s13 = sld [smem:[#allocation8 + $0x3]] }
  0x7c   :  { %v373_v5 = vmul.f32 %v372_v12, %v1069_v20  ;;  %v374_v13 = vmul.f32 %v372_v12, %v1071_v24  ;;  %v375_v15 = vmul.f32 %v372_v12, %v1075_v33  ;;  %v376_v16 = vmul.f32 %v372_v12, %v1077_v34 }
  0x7d   :  { %v391_v21 = vadd.f32 %v1015_v22, %v999_v63  ;;  %v392_v49 = vadd.f32 %v1048_v45, %v1002_v8  ;;  %v393_v47 = vadd.f32 %v1052_v46, %v1005_v9  ;;  %v394_v57 = vadd.f32 %v390_v4, %v1008_v10 }
  0x7e   :  { %v377_v42 = vadd.f32 %v373_v5, %v318_v40  ;;  %v378_v20 = vadd.f32 %v374_v13, %v319_v41  ;;  %v379_v19 = vadd.f32 %v375_v15, %v320_v60  ;;  %v380_v24 = vadd.f32 %v376_v16, %v321_v61  ;;  %v1485_v41 = vld [vmem:[#allocation18_spill] sm:$0xff] }
  0x7f   :  { %v395_v32 = vstv %s1140_s14  ;;  %v404_v33 = vstv %s1146_s15  ;;  %v413_v44 = vstv %s1151_s16  ;;  %v422_v34 = vstv %s1157_s17  ;;  %s1399_s14 = sld [smem:[#allocation10]] }
  0x80   :  { %v396_v26 = vadd.f32 %v395_v32, %v391_v21  ;;  %v397_v63 = vadd.f32 %v395_v32, %v392_v49  ;;  %v398_v22 = vadd.f32 %v395_v32, %v393_v47  ;;  %v399_v8 = vadd.f32 %v395_v32, %v394_v57  ;;  %s1405_s15 = sld [smem:[#allocation10 + $0x1]] }
  0x81   :  { %v431_v45 = vstv %s1165_s2  ;;  %v441_v9 = vmul.f32 %v992_v58, %v901_v0  ;;  %v442_v10 = vmul.f32 %v992_v58, %v908_v1  ;;  %v443_v46 = vmul.f32 %v992_v58, %v913_v2  ;;  %s1407_s16 = sld [smem:[#allocation10 + $0x2]] }
  0x82   :  { %v400_v52 = vmax.f32 %v396_v26, 0.0  ;;  %v401_v53 = vmax.f32 %v397_v63, 0.0  ;;  %v402_v48 = vmax.f32 %v398_v22, 0.0  ;;  %v403_v6 = vmax.f32 %v399_v8, 0.0  ;;  %v1487_v26 = vld [vmem:[#allocation15_spill] sm:$0xff]  ;;  %s1435_s17 = sld [smem:[#allocation10 + $0x3]] }
  0x83   :  { %v444_v30 = vmul.f32 %v992_v58, %v918_v3  ;;  %v445_v27 = vstv %s1163_s0  ;;  %v454_v28 = vstv %s1173_s18  ;;  %v1215_v29 = vstv %s1175_s6 }
  0x84   :  { %v405_v23 = vmul.f32 %v404_v33, %v400_v52  ;;  %v406_v31 = vmul.f32 %v404_v33, %v401_v53  ;;  %v407_v54 = vmul.f32 %v404_v33, %v402_v48  ;;  %v408_v55 = vmul.f32 %v404_v33, %v403_v6 }
  0x85   :  { %v414_v56 = vmul.f32 %v413_v44, %v400_v52  ;;  %v415_v35 = vmul.f32 %v413_v44, %v401_v53  ;;  %v416_v36 = vmul.f32 %v413_v44, %v402_v48  ;;  %v417_v59 = vmul.f32 %v413_v44, %v403_v6 }
  0x86   :  { %v1224_v58 = vadd.f32 %v405_v23, %v1099_v17  ;;  %v1227_v37 = vadd.f32 %v406_v31, %v1101_v18  ;;  %v1230_v40 = vadd.f32 %v407_v54, %v1484_v38  ;;  %v1233_v60 = vadd.f32 %v408_v55, %v1485_v41 }
  0x87   :  { %v1238_v61 = vadd.f32 %v414_v56, %v1129_v14  ;;  %v1241_v12 = vadd.f32 %v415_v35, %v1131_v50  ;;  %v1244_v17 = vadd.f32 %v416_v36, %v1135_v51  ;;  %v1247_v18 = vadd.f32 %v417_v59, %v1137_v25 }
  0x88   :  { %v423_v4 = vmul.f32 %v422_v34, %v400_v52  ;;  %v424_v5 = vmul.f32 %v422_v34, %v401_v53  ;;  %v425_v13 = vmul.f32 %v422_v34, %v402_v48  ;;  %v426_v15 = vmul.f32 %v422_v34, %v403_v6  ;;  %v1486_v34 = vld [vmem:[#allocation14_spill] sm:$0xff] }
  0x89   :  { %v432_v16 = vmul.f32 %v431_v45, %v400_v52  ;;  %v433_v14 = vmul.f32 %v431_v45, %v401_v53  ;;  %v434_v50 = vmul.f32 %v431_v45, %v402_v48  ;;  %v435_v21 = vmul.f32 %v431_v45, %v403_v6 }
  0x8a   :  { %v1254_v51 = vadd.f32 %v423_v4, %v1169_v43  ;;  %v1257_v25 = vadd.f32 %v424_v5, %v1171_v39  ;;  %v1260_v49 = vadd.f32 %v425_v13, %v1177_v62  ;;  %v1263_v47 = vadd.f32 %v426_v15, %v1179_v11  ;;  %v1488_v39 = vld [vmem:[#allocation16_spill] sm:$0xff] }
  0x8b   :  { %v1265_v57 = vadd.f32 %v432_v16, %v377_v42  ;;  %v1267_v32 = vadd.f32 %v433_v14, %v378_v20  ;;  %v1269_v33 = vadd.f32 %v434_v50, %v379_v19  ;;  %v1271_v44 = vadd.f32 %v435_v21, %v380_v24 }
  0x8c   :  { %v446_v43 = vmul.f32 %v1486_v34, %v445_v27  ;;  %v447_v63 = vmul.f32 %v1487_v26, %v445_v27  ;;  %v448_v22 = vmul.f32 %v1488_v39, %v445_v27  ;;  %v449_v62 = vmul.f32 %v942_v7, %v445_v27 }
  0x8d   :  { %v472_v8 = vstv %s1208_s20  ;;  %v481_v11 = vstv %s1217_s21  ;;  %v490_v42 = vstv %s1219_s22  ;;  %v499_v20 = vstv %s1206_s19 }
  0x8e   :  { %v450_v19 = vadd.f32 %v446_v43, %v441_v9  ;;  %v451_v45 = vadd.f32 %v447_v63, %v442_v10  ;;  %v452_v24 = vadd.f32 %v448_v22, %v443_v46  ;;  %v453_v52 = vadd.f32 %v449_v62, %v444_v30 }
  0x8f   :  { %v500_v53 = vmul.f32 %v499_v20, %v901_v0  ;;  %v501_v48 = vmul.f32 %v499_v20, %v908_v1  ;;  %v502_v6 = vmul.f32 %v499_v20, %v913_v2  ;;  %v503_v27 = vmul.f32 %v499_v20, %v918_v3 }
  0x90   :  { %v455_v23 = vadd.f32 %v454_v28, %v450_v19  ;;  %v456_v31 = vadd.f32 %v454_v28, %v451_v45  ;;  %v457_v54 = vadd.f32 %v454_v28, %v452_v24  ;;  %v458_v55 = vadd.f32 %v454_v28, %v453_v52 }
  0x91   :  { %v504_v56 = vstv %s1221_s23  ;;  %v513_v35 = vstv %s1235_s4  ;;  %v1288_v36 = vstv %s1249_s24  ;;  %v1291_v9 = vstv %s1251_s25 }
  0x92   :  { %v459_v10 = vmax.f32 %v455_v23, 0.0  ;;  %v460_v46 = vmax.f32 %v456_v31, 0.0  ;;  %v461_v30 = vmax.f32 %v457_v54, 0.0  ;;  %v462_v59 = vmax.f32 %v458_v55, 0.0 }
  0x93   :  { %v505_v38 = vmul.f32 %v1486_v34, %v504_v56  ;;  %v506_v41 = vmul.f32 %v1487_v26, %v504_v56  ;;  %v507_v28 = vmul.f32 %v1488_v39, %v504_v56  ;;  %v508_v4 = vmul.f32 %v942_v7, %v504_v56 }
  0x94   :  { %v464_v5 = vmul.f32 %v1215_v29, %v459_v10  ;;  %v465_v13 = vmul.f32 %v1215_v29, %v460_v46  ;;  %v466_v15 = vmul.f32 %v1215_v29, %v461_v30  ;;  %v467_v16 = vmul.f32 %v1215_v29, %v462_v59 }
  0x95   :  { %v473_v14 = vmul.f32 %v472_v8, %v459_v10  ;;  %v474_v50 = vmul.f32 %v472_v8, %v460_v46  ;;  %v475_v21 = vmul.f32 %v472_v8, %v461_v30  ;;  %v476_v43 = vmul.f32 %v472_v8, %v462_v59 }
  0x96   :  { %v1310_v63 = vadd.f32 %v464_v5, %v1224_v58  ;;  %v1313_v22 = vadd.f32 %v465_v13, %v1227_v37  ;;  %v1316_v62 = vadd.f32 %v466_v15, %v1230_v40  ;;  %v1319_v20 = vadd.f32 %v467_v16, %v1233_v60 }
  0x97   :  { %v1322_v29 = vadd.f32 %v473_v14, %v1238_v61  ;;  %v1325_v19 = vadd.f32 %v474_v50, %v1241_v12  ;;  %v1328_v8 = vadd.f32 %v475_v21, %v1244_v17  ;;  %v1331_v58 = vadd.f32 %v476_v43, %v1247_v18 }
  0x98   :  { %v482_v37 = vmul.f32 %v481_v11, %v459_v10  ;;  %v483_v45 = vmul.f32 %v481_v11, %v460_v46  ;;  %v484_v24 = vmul.f32 %v481_v11, %v461_v30  ;;  %v485_v40 = vmul.f32 %v481_v11, %v462_v59 }
  0x99   :  { %v491_v52 = vmul.f32 %v490_v42, %v459_v10  ;;  %v492_v23 = vmul.f32 %v490_v42, %v460_v46  ;;  %v493_v60 = vmul.f32 %v490_v42, %v461_v30  ;;  %v494_v31 = vmul.f32 %v490_v42, %v462_v59 }
  0x9a   :  { %v1334_v61 = vadd.f32 %v482_v37, %v1254_v51  ;;  %v1337_v12 = vadd.f32 %v483_v45, %v1257_v25  ;;  %v1340_v17 = vadd.f32 %v484_v24, %v1260_v49  ;;  %v1343_v18 = vadd.f32 %v485_v40, %v1263_v47 }
  0x9b   :  { %v1346_v11 = vadd.f32 %v491_v52, %v1265_v57  ;;  %v1349_v42 = vadd.f32 %v492_v23, %v1267_v32  ;;  %v1352_v51 = vadd.f32 %v493_v60, %v1269_v33  ;;  %v1355_v54 = vadd.f32 %v494_v31, %v1271_v44 }
  0x9c   :  { %v509_v25 = vadd.f32 %v505_v38, %v500_v53  ;;  %v510_v49 = vadd.f32 %v506_v41, %v501_v48  ;;  %v511_v55 = vadd.f32 %v507_v28, %v502_v6  ;;  %v512_v56 = vadd.f32 %v508_v4, %v503_v27 }
  0x9d   :  { %v540_v47 = vstv %s1301_s28  ;;  %v549_v57 = vstv %s1307_s29  ;;  %v558_v10 = vstv %s1293_s26  ;;  %v563_v46 = vstv %s1295_s27 }
  0x9e   :  { %v514_v32 = vadd.f32 %v513_v35, %v509_v25  ;;  %v515_v33 = vadd.f32 %v513_v35, %v510_v49  ;;  %v516_v30 = vadd.f32 %v513_v35, %v511_v55  ;;  %v517_v59 = vadd.f32 %v513_v35, %v512_v56 }
  0x9f   :  { %v559_v44 = vmul.f32 %v558_v10, %v901_v0  ;;  %v560_v53 = vmul.f32 %v558_v10, %v908_v1  ;;  %v561_v48 = vmul.f32 %v558_v10, %v913_v2  ;;  %v562_v6 = vmul.f32 %v558_v10, %v918_v3 }
  0xa0   :  { %v518_v27 = vmax.f32 %v514_v32, 0.0  ;;  %v519_v38 = vmax.f32 %v515_v33, 0.0  ;;  %v520_v41 = vmax.f32 %v516_v30, 0.0  ;;  %v521_v28 = vmax.f32 %v517_v59, 0.0 }
  0xa1   :  { %v564_v35 = vmul.f32 %v1486_v34, %v563_v46  ;;  %v565_v4 = vmul.f32 %v1487_v26, %v563_v46  ;;  %v566_v0 = vmul.f32 %v1488_v39, %v563_v46  ;;  %v567_v1 = vmul.f32 %v942_v7, %v563_v46 }
  0xa2   :  { %v523_v2 = vmul.f32 %v1288_v36, %v518_v27  ;;  %v524_v3 = vmul.f32 %v1288_v36, %v519_v38  ;;  %v525_v5 = vmul.f32 %v1288_v36, %v520_v41  ;;  %v526_v13 = vmul.f32 %v1288_v36, %v521_v28 }
  0xa3   :  { %v532_v34 = vmul.f32 %v1291_v9, %v518_v27  ;;  %v533_v26 = vmul.f32 %v1291_v9, %v519_v38  ;;  %v534_v39 = vmul.f32 %v1291_v9, %v520_v41  ;;  %v535_v7 = vmul.f32 %v1291_v9, %v521_v28 }
  0xa4   :  { %v527_v15 = vadd.f32 %v523_v2, %v1310_v63  ;;  %v528_v16 = vadd.f32 %v524_v3, %v1313_v22  ;;  %v529_v14 = vadd.f32 %v525_v5, %v1316_v62  ;;  %v530_v36 = vadd.f32 %v526_v13, %v1319_v20 }
  0xa5   :  { %v536_v50 = vadd.f32 %v532_v34, %v1322_v29  ;;  %v537_v21 = vadd.f32 %v533_v26, %v1325_v19  ;;  %v538_v43 = vadd.f32 %v534_v39, %v1328_v8  ;;  %v539_v9 = vadd.f32 %v535_v7, %v1331_v58 }
  0xa6   :  { %v541_v37 = vmul.f32 %v540_v47, %v518_v27  ;;  %v542_v63 = vmul.f32 %v540_v47, %v519_v38  ;;  %v543_v45 = vmul.f32 %v540_v47, %v520_v41  ;;  %v544_v22 = vmul.f32 %v540_v47, %v521_v28 }
  0xa7   :  { %v550_v62 = vmul.f32 %v549_v57, %v518_v27  ;;  %v551_v20 = vmul.f32 %v549_v57, %v519_v38  ;;  %v552_v24 = vmul.f32 %v549_v57, %v520_v41  ;;  %v553_v29 = vmul.f32 %v549_v57, %v521_v28 }
  0xa8   :  { %v545_v19 = vadd.f32 %v541_v37, %v1334_v61  ;;  %v546_v8 = vadd.f32 %v542_v63, %v1337_v12  ;;  %v547_v58 = vadd.f32 %v543_v45, %v1340_v17  ;;  %v548_v40 = vadd.f32 %v544_v22, %v1343_v18 }
  0xa9   :  { %v554_v52 = vadd.f32 %v550_v62, %v1346_v11  ;;  %v555_v23 = vadd.f32 %v551_v20, %v1349_v42  ;;  %v556_v60 = vadd.f32 %v552_v24, %v1352_v51  ;;  %v557_v31 = vadd.f32 %v553_v29, %v1355_v54 }
  0xaa   :  { %v568_v25 = vadd.f32 %v564_v35, %v559_v44  ;;  %v569_v61 = vadd.f32 %v565_v4, %v560_v53  ;;  %v570_v49 = vadd.f32 %v566_v0, %v561_v48  ;;  %v571_v12 = vadd.f32 %v567_v1, %v562_v6 }
  0xab   :  { %v572_v55 = vstv %s1357_s30  ;;  %v581_v17 = vstv %s1359_s8  ;;  %v590_v18 = vstv %s1365_s9  ;;  %v599_v11 = vstv %s1367_s1 }
  0xac   :  { %v573_v42 = vadd.f32 %v572_v55, %v568_v25  ;;  %v574_v56 = vadd.f32 %v572_v55, %v569_v61  ;;  %v575_v47 = vadd.f32 %v572_v55, %v570_v49  ;;  %v576_v51 = vadd.f32 %v572_v55, %v571_v12 }
  0xad   :  { %v608_v57 = vstv %s1373_s3  ;;  %v617_v10 = vstv %s1375_s10  ;;  %v626_v54 = vstv %s1399_s14  ;;  %v631_v46 = vstv %s1381_s11 }
  0xae   :  { %v577_v32 = vmax.f32 %v573_v42, 0.0  ;;  %v578_v33 = vmax.f32 %v574_v56, 0.0  ;;  %v579_v30 = vmax.f32 %v575_v47, 0.0  ;;  %v580_v59 = vmax.f32 %v576_v51, 0.0 }
  0xaf   :  { %v640_v44 = vstv %s1405_s15  ;;  %v1427_v53 = vstv %s1387_s12  ;;  %v1430_v48 = vstv %s1407_s16  ;;  %v1433_v6 = vstv %s1393_s13 }
  0xb0   :  { %v582_v27 = vmul.f32 %v581_v17, %v577_v32  ;;  %v583_v38 = vmul.f32 %v581_v17, %v578_v33  ;;  %v584_v41 = vmul.f32 %v581_v17, %v579_v30  ;;  %v585_v28 = vmul.f32 %v581_v17, %v580_v59 }
  0xb1   :  { %v591_v35 = vmul.f32 %v590_v18, %v577_v32  ;;  %v592_v4 = vmul.f32 %v590_v18, %v578_v33  ;;  %v593_v0 = vmul.f32 %v590_v18, %v579_v30  ;;  %v594_v1 = vmul.f32 %v590_v18, %v580_v59 }
  0xb2   :  { %v586_v2 = vadd.f32 %v582_v27, %v527_v15  ;;  %v587_v3 = vadd.f32 %v583_v38, %v528_v16  ;;  %v588_v5 = vadd.f32 %v584_v41, %v529_v14  ;;  %v589_v13 = vadd.f32 %v585_v28, %v530_v36 }
  0xb3   :  { %v595_v34 = vadd.f32 %v591_v35, %v536_v50  ;;  %v596_v26 = vadd.f32 %v592_v4, %v537_v21  ;;  %v597_v39 = vadd.f32 %v593_v0, %v538_v43  ;;  %v598_v7 = vadd.f32 %v594_v1, %v539_v9 }
  0xb4   :  { %v600_v37 = vmul.f32 %v599_v11, %v577_v32  ;;  %v601_v63 = vmul.f32 %v599_v11, %v578_v33  ;;  %v602_v45 = vmul.f32 %v599_v11, %v579_v30  ;;  %v603_v22 = vmul.f32 %v599_v11, %v580_v59 }
  0xb5   :  { %v609_v62 = vmul.f32 %v608_v57, %v577_v32  ;;  %v610_v20 = vmul.f32 %v608_v57, %v578_v33  ;;  %v611_v24 = vmul.f32 %v608_v57, %v579_v30  ;;  %v612_v29 = vmul.f32 %v608_v57, %v580_v59 }
  0xb6   :  { %v604_v25 = vadd.f32 %v600_v37, %v545_v19  ;;  %v605_v61 = vadd.f32 %v601_v63, %v546_v8  ;;  %v606_v49 = vadd.f32 %v602_v45, %v547_v58  ;;  %v607_v12 = vadd.f32 %v603_v22, %v548_v40 }
  0xb7   :  { %v613_v15 = vadd.f32 %v609_v62, %v554_v52  ;;  %v614_v16 = vadd.f32 %v610_v20, %v555_v23  ;;  %v615_v14 = vadd.f32 %v611_v24, %v556_v60  ;;  %v616_v36 = vadd.f32 %v612_v29, %v557_v31 }
  0xb8   :  { %v618_v50 = vadd.f32 %v617_v10, %v586_v2  ;;  %v619_v21 = vadd.f32 %v617_v10, %v587_v3  ;;  %v620_v43 = vadd.f32 %v617_v10, %v588_v5  ;;  %v621_v9 = vadd.f32 %v617_v10, %v589_v13 }
  0xb9   :  { %v632_v55 = vadd.f32 %v631_v46, %v595_v34  ;;  %v633_v17 = vadd.f32 %v631_v46, %v596_v26  ;;  %v634_v18 = vadd.f32 %v631_v46, %v597_v39  ;;  %v635_v11 = vadd.f32 %v631_v46, %v598_v7 }
  0xba   :  { %v622_v42 = vmax.f32 %v618_v50, 0.0  ;;  %v623_v56 = vmax.f32 %v619_v21, 0.0  ;;  %v624_v47 = vmax.f32 %v620_v43, 0.0  ;;  %v625_v51 = vmax.f32 %v621_v9, 0.0 }
  0xbb   :  { %v636_v19 = vmax.f32 %v632_v55, 0.0  ;;  %v637_v8 = vmax.f32 %v633_v17, 0.0  ;;  %v638_v58 = vmax.f32 %v634_v18, 0.0  ;;  %v639_v40 = vmax.f32 %v635_v11, 0.0 }
  0xbc   :  { %v627_v52 = vmul.f32 %v626_v54, %v622_v42  ;;  %v628_v23 = vmul.f32 %v626_v54, %v623_v56  ;;  %v629_v60 = vmul.f32 %v626_v54, %v624_v47  ;;  %v630_v31 = vmul.f32 %v626_v54, %v625_v51 }
  0xbd   :  { %v641_v57 = vmul.f32 %v640_v44, %v636_v19  ;;  %v642_v10 = vmul.f32 %v640_v44, %v637_v8  ;;  %v643_v32 = vmul.f32 %v640_v44, %v638_v58  ;;  %v644_v33 = vmul.f32 %v640_v44, %v639_v40 }
  0xbe   :  { %v650_v46 = vadd.f32 %v1427_v53, %v604_v25  ;;  %v651_v30 = vadd.f32 %v1427_v53, %v605_v61  ;;  %v652_v59 = vadd.f32 %v1427_v53, %v606_v49  ;;  %v653_v27 = vadd.f32 %v1427_v53, %v607_v12 }
  0xbf   :  { %v645_v38 = vadd.f32 %v641_v57, %v627_v52  ;;  %v646_v41 = vadd.f32 %v642_v10, %v628_v23  ;;  %v647_v28 = vadd.f32 %v643_v32, %v629_v60  ;;  %v648_v35 = vadd.f32 %v644_v33, %v630_v31 }
  0xc0   :  { %v654_v4 = vmax.f32 %v650_v46, 0.0  ;;  %v655_v54 = vmax.f32 %v651_v30, 0.0  ;;  %v656_v0 = vmax.f32 %v652_v59, 0.0  ;;  %v657_v1 = vmax.f32 %v653_v27, 0.0 }
  0xc1   :  { %v668_v2 = vadd.f32 %v1433_v6, %v613_v15  ;;  %v669_v44 = vadd.f32 %v1433_v6, %v614_v16  ;;  %v670_v3 = vadd.f32 %v1433_v6, %v615_v14  ;;  %v671_v5 = vadd.f32 %v1433_v6, %v616_v36 }
  0xc2   :  { %v659_v13 = vmul.f32 %v1430_v48, %v654_v4  ;;  %v660_v53 = vmul.f32 %v1430_v48, %v655_v54  ;;  %v661_v34 = vmul.f32 %v1430_v48, %v656_v0  ;;  %v662_v26 = vmul.f32 %v1430_v48, %v657_v1 }
  0xc3   :  { %v672_v39 = vmax.f32 %v668_v2, 0.0  ;;  %v673_v7 = vmax.f32 %v669_v44, 0.0  ;;  %v674_v37 = vmax.f32 %v670_v3, 0.0  ;;  %v675_v63 = vmax.f32 %v671_v5, 0.0 }
  0xc4   :  { %v663_v45 = vadd.f32 %v659_v13, %v645_v38  ;;  %v664_v22 = vadd.f32 %v660_v53, %v646_v41  ;;  %v665_v62 = vadd.f32 %v661_v34, %v647_v28  ;;  %v666_v20 = vadd.f32 %v662_v26, %v648_v35 }
  0xc5   :  { %v676_v24 = vstv %s1435_s17  ;;  %v685_v49 = vstv %s1470_s5 }
  0xc6   :  { %v677_v29 = vmul.f32 %v676_v24, %v672_v39  ;;  %v678_v25 = vmul.f32 %v676_v24, %v673_v7  ;;  %v679_v6 = vmul.f32 %v676_v24, %v674_v37  ;;  %v680_v61 = vmul.f32 %v676_v24, %v675_v63 }
  0xc8   :  { %v681_v12 = vadd.f32 %v677_v29, %v663_v45  ;;  %v682_v15 = vadd.f32 %v678_v25, %v664_v22  ;;  %v683_v48 = vadd.f32 %v679_v6, %v665_v62  ;;  %v684_v16 = vadd.f32 %v680_v61, %v666_v20 }
  0xca   :  { %v686_v14 = vadd.f32 %v685_v49, %v681_v12  ;;  %v687_v36 = vadd.f32 %v685_v49, %v682_v15  ;;  %v688_v50 = vadd.f32 %v685_v49, %v683_v48  ;;  %v689_v21 = vadd.f32 %v685_v49, %v684_v16 }
  0xcc   :  { %690 = vst [vmem:[%s1472_s7] sm:$0xff] %v686_v14  ;;  %691 = vst [vmem:[%s1472_s7 + $0x8] sm:$0xff] %v687_v36 }
  0xcd   :  { %692 = vst [vmem:[%s1472_s7 + $0x10] sm:$0xff] %v688_v50  ;;  %693 = vst [vmem:[%s1472_s7 + $0x18] sm:$0xff] %v689_v21 }
  0xce   :  { %698 = vsyncpa [#allocation4], 1 }
  0xcf   :  { %699 = vsyncpa [#allocation6], 1 }
  0xd0   :  { %700 = vsyncpa [#allocation9], 1 }

</bundles_post_ra>
